<compile_context>
chip_gen: v7x
topology: tpu7x:2x2x1
jax: 0.10.0
libtpu: 0.0.40
codegen_flags: <defaults>
</compile_context>

<pallas_src>
import functools

import jax
import jax.numpy as jnp
from jax.experimental import pallas as pl
from jax.experimental.pallas import tpu as pltpu

EPS = 1e-5


def _round_up(x, m):
    return ((x + m - 1) // m) * m


def _sublane_multiple(dtype):
    itemsize = jnp.dtype(dtype).itemsize
    if itemsize >= 4:
        return 8
    if itemsize == 2:
        return 16
    return 32


def _vmem_capacity_bytes():
    """Physical VMEM per TensorCore (64 MiB v7x, 128 MiB v5e/v6e), conservative fallback."""
    try:
        info = pltpu.get_tpu_info()
        cap = getattr(info, "vmem_capacity_bytes", None)
        if cap:
            return int(cap)
    except Exception:
        pass
    return 64 * 1024 * 1024


# --------------------------------------------------------------------------------------
# One-time parameter preparation (hoisted out of the per-call path).
# --------------------------------------------------------------------------------------
def prepare_params(params, c, *, mxu_dtype=jnp.bfloat16):
    """Fold LN1 affine into linear1, zero-pad channels to a multiple of 128, cast the
    three (C, C) weights to the MXU operand dtype, and pack the 5 remaining per-channel
    vectors (wb1', wb2, wb3, g2, b2) into one (8, Cp) f32 array."""
    (g1, b1, w1, wb1, w2, wb2, w3, wb3, g2, b2) = params
    cp = _round_up(c, 128)
    pc = cp - c

    # Fold norm1's affine: (z*g1 + b1) @ W1 + wb1 == z @ (diag(g1) @ W1) + (b1 @ W1 + wb1)
    w1f = w1 * g1.astype(jnp.float32)[:, None]
    wb1f = wb1.astype(jnp.float32) + b1.astype(jnp.float32) @ w1.astype(jnp.float32)

    def pad_vec(v):  # (C,) -> (Cp,), zero-padded f32
        return jnp.pad(v.astype(jnp.float32), (0, pc))

    def pad_mat(w):  # (C, C) -> (Cp, Cp), zero-padded, bf16 MXU operand
        return jnp.pad(w.astype(jnp.float32), ((0, pc), (0, pc))).astype(mxu_dtype)

    zero = jnp.zeros((cp,), jnp.float32)
    vecs = jnp.stack(
        [pad_vec(wb1f), pad_vec(wb2), pad_vec(wb3), pad_vec(g2), pad_vec(b2),
         zero, zero, zero], axis=0)                       # (8, Cp) — one lane-dense slab

    return {
        "vecs": vecs,
        "w1": pad_mat(w1f), "w2": pad_mat(w2), "w3": pad_mat(w3),
        "c": int(c), "cp": int(cp), "mxu_dtype": mxu_dtype,
    }


# --------------------------------------------------------------------------------------
# Kernel
# --------------------------------------------------------------------------------------
def transition_kernel(x_ref, vecs_ref, w1_ref, w2_ref, w3_ref, o_ref, *scratch,
                      c_real, pc, needs_cpad, mxu_dtype):
    inv_c = 1.0 / float(c_real)
    fpc = float(pc)

    if needs_cpad:
        # Load the unpadded (tm, C) block into a zeroed lane-dense (tm, Cp) scratch.
        xpad_ref = scratch[0]
        xpad_ref[...] = jnp.zeros_like(xpad_ref)          # keep padded lanes exactly 0
        xpad_ref[:, 0:c_real] = x_ref[...].astype(jnp.float32)
        x = xpad_ref[...]
    else:
        x = x_ref[...].astype(jnp.float32)

    def layernorm_stats(v):
        # Two-pass mean/variance. Padded lanes of v are exactly zero, so
        # sum((v - mu)^2) over-counts them by pc * mu^2; subtract it out and divide
        # by the real channel count -> identical semantics to nn.LayerNorm(c).
        mu = jnp.sum(v, axis=-1, keepdims=True) * inv_c
        d = v - mu
        var = (jnp.sum(d * d, axis=-1, keepdims=True) - fpc * mu * mu) * inv_c
        return mu, jax.lax.rsqrt(jnp.maximum(var, 0.0) + EPS)

    wb1 = vecs_ref[0:1, :]
    wb2 = vecs_ref[1:2, :]
    wb3 = vecs_ref[2:3, :]
    g2 = vecs_ref[3:4, :]
    b2 = vecs_ref[4:5, :]

    # norm1 (affine folded into W1/wb1): z = (x - mu) * rsqrt(var)
    mu1, rstd1 = layernorm_stats(x)
    z = (x - mu1) * rstd1

    # linear1 + relu   (bf16 MXU operands, f32 accumulation)
    h = jnp.dot(z.astype(mxu_dtype), w1_ref[...],
                preferred_element_type=jnp.float32) + wb1
    h = jnp.maximum(h, 0.0)

    # linear2 + relu
    h = jnp.dot(h.astype(mxu_dtype), w2_ref[...],
                preferred_element_type=jnp.float32) + wb2
    h = jnp.maximum(h, 0.0)

    # residual + linear3
    h = x + jnp.dot(h.astype(mxu_dtype), w3_ref[...],
                    preferred_element_type=jnp.float32) + wb3

    # norm2
    mu2, rstd2 = layernorm_stats(h)
    out = (h - mu2) * rstd2 * g2 + b2

    if needs_cpad:
        o_ref[...] = out[:, 0:c_real].astype(o_ref.dtype)
    else:
        o_ref[...] = out.astype(o_ref.dtype)


# --------------------------------------------------------------------------------------
# Wrapper
# --------------------------------------------------------------------------------------
def transition_module(s_, prepared, *, tm=None):
    """s_: (..., C) channel-last. `prepared` comes from prepare_params(). Returns same
    shape/dtype as s_."""
    orig_shape = s_.shape
    c = orig_shape[-1]
    assert c == prepared["c"], "prepared params were built for a different C"
    cp = prepared["cp"]
    mxu_dtype = prepared["mxu_dtype"]
    pc = cp - c
    needs_cpad = pc > 0

    x2d = s_.reshape(-1, c)
    rows = x2d.shape[0]

    # ---- generation-aware VMEM budget / limit ---------------------------------
    vmem_cap = _vmem_capacity_bytes()                 # 64 MiB (v7x) or 128 MiB (v5e/v6e)
    budget = vmem_cap - 24 * 1024 * 1024              # what the tm auto-sizer may plan for

    in_bytes = jnp.dtype(s_.dtype).itemsize
    w_bytes = jnp.dtype(mxu_dtype).itemsize
    weight_resident = 3 * cp * cp * w_bytes + 8 * cp * 4        # single-buffered
    # dbl-buffered in/out tiles + f32 working set (x, h, d*d, dot out, bf16 cast, pad scratch)
    per_row = cp * (2 * in_bytes + 2 * in_bytes + 7 * 4)

    sub = _sublane_multiple(s_.dtype)                 # 8 f32 / 16 bf16 / 32 int8
    avail = budget - weight_resident
    if tm is None:
        if avail <= per_row * sub:
            # TODO(synk): stream (Cp, tn) weight column-tiles from HBM with a manual
            # double-buffered DMA (or emit_pipeline) so very large C keeps large row
            # tiles instead of collapsing tm; not needed while the weights fit VMEM.
            tm = sub
        else:
            tm = max(sub, min(1024, (avail // per_row) // sub * sub))
    tm = max(sub, _round_up(tm, sub))
    tm = min(tm, _round_up(rows, sub))
    # Keep the single "parallel" grid axis >= 2 steps so both v7x TensorCores get work.
    if rows > sub:
        tm = min(tm, max(sub, _round_up((rows + 1) // 2, sub)))

    # ---- row padding only (no channel padding of the activation in HBM) -------
    rp = _round_up(rows, tm)
    if rp != rows:
        x2d = jnp.pad(x2d, ((0, rp - rows), (0, 0)))

    grid = (rp // tm,)

    row_spec = pl.BlockSpec((tm, c), lambda i: (i, 0))
    # Constant index maps: nothing to prefetch -> single-buffer to halve VMEM use.
    vec_spec = pl.BlockSpec((8, cp), lambda i: (0, 0), pipeline_mode=pl.Buffered(1))
    mat_spec = pl.BlockSpec((cp, cp), lambda i: (0, 0), pipeline_mode=pl.Buffered(1))

    scratch_shapes = [pltpu.VMEM((tm, cp), jnp.float32)] if needs_cpad else []

    vmem_est = weight_resident + tm * per_row
    vmem_limit = int(min(vmem_cap - 8 * 1024 * 1024,               # clamp to physical
                         max(32 * 1024 * 1024, vmem_est + 16 * 1024 * 1024)))

    cost = pl.CostEstimate(
        flops=6 * rp * cp * cp + 16 * rp * cp,
        transcendentals=2 * rp,
        bytes_accessed=2 * rp * c * in_bytes + 3 * cp * cp * w_bytes + 8 * cp * 4,
    )

    kernel = functools.partial(transition_kernel, c_real=c, pc=pc,
                               needs_cpad=needs_cpad, mxu_dtype=mxu_dtype)

    out2d = pl.pallas_call(
        kernel,
        out_shape=jax.ShapeDtypeStruct((rp, c), s_.dtype),
        grid_spec=pltpu.PrefetchScalarGridSpec(
            num_scalar_prefetch=0,
            grid=grid,
            in_specs=[
                row_spec,    # x tile (unpadded channels)
                vec_spec,    # packed per-channel vectors (wb1', wb2, wb3, g2, b2)
                mat_spec,    # W1 (LN1 affine folded in)
                mat_spec,    # W2
                mat_spec,    # W3
            ],
            out_specs=row_spec,
            scratch_shapes=scratch_shapes,
        ),
        compiler_params=pltpu.CompilerParams(
            dimension_semantics=("parallel",),
            vmem_limit_bytes=vmem_limit),
        cost_estimate=cost,
    )(x2d, prepared["vecs"], prepared["w1"], prepared["w2"], prepared["w3"])

    return out2d[:rows, :].reshape(orig_shape)


# --------------------------------------------------------------------------------------
# Synthetic params + pure-JAX reference
# --------------------------------------------------------------------------------------
def init_params(c, key):
    """Deterministic synthetic parameters. Linear weights stored as (in, out)
    so y = x @ W + b."""
    ks = jax.random.split(key, 6)
    scale = 1.0 / jnp.sqrt(c)
    g1 = jnp.ones((c,), jnp.float32)
    b1 = jnp.zeros((c,), jnp.float32)
    w1 = jax.random.normal(ks[0], (c, c), jnp.float32) * scale
    wb1 = jax.random.normal(ks[1], (c,), jnp.float32) * 0.01
    w2 = jax.random.normal(ks[2], (c, c), jnp.float32) * scale
    wb2 = jax.random.normal(ks[3], (c,), jnp.float32) * 0.01
    w3 = jax.random.normal(ks[4], (c, c), jnp.float32) * scale
    wb3 = jax.random.normal(ks[5], (c,), jnp.float32) * 0.01
    g2 = jnp.ones((c,), jnp.float32)
    b2 = jnp.zeros((c,), jnp.float32)
    return (g1, b1, w1, wb1, w2, wb2, w3, wb3, g2, b2)


def _layernorm_ref(x, gamma, beta):
    mu = jnp.mean(x, axis=-1, keepdims=True)
    var = jnp.mean((x - mu) * (x - mu), axis=-1, keepdims=True)
    return (x - mu) * jax.lax.rsqrt(var + EPS) * gamma + beta


def reference(s_, params):
    (g1, b1, w1, wb1, w2, wb2, w3, wb3, g2, b2) = params
    x = s_.astype(jnp.float32)
    s = _layernorm_ref(x, g1, b1)
    s = jax.nn.relu(s @ w1 + wb1)
    s = jax.nn.relu(s @ w2 + wb2)
    s = x + (s @ w3 + wb3)
    return _layernorm_ref(s, g2, b2).astype(s_.dtype)


if __name__ == "__main__":
    B, N, C = 2, 8, 32   # small shapes: batch=2, seq=8, hidden=32
    key = jax.random.PRNGKey(0)
    kx, kp = jax.random.split(key)
    s_in = jax.random.normal(kx, (B, N, C), jnp.float32)
    params = init_params(C, kp)

    prepared = prepare_params(params, C)        # one-time: fold/pad/cast/pack
    out = transition_module(s_in, prepared)
    out = jax.block_until_ready(out)

    ref = reference(s_in, params)
    assert out.shape == s_in.shape and out.dtype == s_in.dtype
    # bf16 MXU operands with f32 accumulation -> loosened tolerance vs f32 reference
    assert jnp.allclose(out, ref, atol=2e-2, rtol=2e-2), "mismatch vs reference"
    print("KERNEL_OK")
</pallas_src>

<mosaic_0001>
module attributes {stable_mosaic.version = 11 : i64} {
  func.func @transition_kernel(%arg0: i32, %arg1: memref<8x32xf32, #tpu.memory_space<vmem>>, %arg2: memref<8x128xf32, #tpu.memory_space<vmem>>, %arg3: memref<128x128xbf16, #tpu.memory_space<vmem>>, %arg4: memref<128x128xbf16, #tpu.memory_space<vmem>>, %arg5: memref<128x128xbf16, #tpu.memory_space<vmem>>, %arg6: memref<8x32xf32, #tpu.memory_space<vmem>>, %arg7: memref<8x128xf32, #tpu.memory_space<vmem>>) attributes {dimension_semantics = [#tpu.dimension_semantics<parallel>], iteration_bounds = array<i64: 2>, scalar_prefetch = 0 : i64, scratch_operands = 1 : i64, tpu.core_type = #tpu.core_type<tc>, window_params = [{transform_indices = @transform_0, window_bounds = array<i64: 8, 32>}, {pipeline_mode = #tpu.pipeline_mode<synchronous>, transform_indices = @transform_1, window_bounds = array<i64: 8, 128>}, {pipeline_mode = #tpu.pipeline_mode<synchronous>, transform_indices = @transform_2, window_bounds = array<i64: 128, 128>}, {pipeline_mode = #tpu.pipeline_mode<synchronous>, transform_indices = @transform_3, window_bounds = array<i64: 128, 128>}, {pipeline_mode = #tpu.pipeline_mode<synchronous>, transform_indices = @transform_4, window_bounds = array<i64: 128, 128>}, {transform_indices = @transform_5, window_bounds = array<i64: 8, 32>}]} {
    %cst = arith.constant 0.000000e+00 : f32
    %0 = vector.broadcast %cst : f32 to vector<8x128xf32>
    %c0 = arith.constant 0 : index
    %c0_0 = arith.constant 0 : index
    %1 = vector.load %arg7[%c0, %c0_0] : memref<8x128xf32, #tpu.memory_space<vmem>>, vector<8x128xf32>
    tpu.vector_store %arg7[%c0, %c0_0], %0 {strides = array<i32>} : memref<8x128xf32, #tpu.memory_space<vmem>>, vector<8x128xf32>,
    %c0_1 = arith.constant 0 : index
    %c0_2 = arith.constant 0 : index
    %2 = vector.load %arg1[%c0_1, %c0_2] : memref<8x32xf32, #tpu.memory_space<vmem>>, vector<8x32xf32>
    %c0_3 = arith.constant 0 : index
    %c0_4 = arith.constant 0 : index
    %3 = vector.load %arg7[%c0_3, %c0_4] : memref<8x128xf32, #tpu.memory_space<vmem>>, vector<8x32xf32>
    tpu.vector_store %arg7[%c0_3, %c0_4], %2 {strides = array<i32>} : memref<8x128xf32, #tpu.memory_space<vmem>>, vector<8x32xf32>,
    %c0_5 = arith.constant 0 : index
    %c0_6 = arith.constant 0 : index
    %4 = vector.load %arg7[%c0_5, %c0_6] : memref<8x128xf32, #tpu.memory_space<vmem>>, vector<8x128xf32>
    %c0_7 = arith.constant 0 : index
    %c0_8 = arith.constant 0 : index
    %5 = vector.load %arg2[%c0_7, %c0_8] : memref<8x128xf32, #tpu.memory_space<vmem>>, vector<1x128xf32>
    %c1 = arith.constant 1 : index
    %c0_9 = arith.constant 0 : index
    %6 = vector.load %arg2[%c1, %c0_9] : memref<8x128xf32, #tpu.memory_space<vmem>>, vector<1x128xf32>
    %c2 = arith.constant 2 : index
    %c0_10 = arith.constant 0 : index
    %7 = vector.load %arg2[%c2, %c0_10] : memref<8x128xf32, #tpu.memory_space<vmem>>, vector<1x128xf32>
    %c3 = arith.constant 3 : index
    %c0_11 = arith.constant 0 : index
    %8 = vector.load %arg2[%c3, %c0_11] : memref<8x128xf32, #tpu.memory_space<vmem>>, vector<1x128xf32>
    %c4 = arith.constant 4 : index
    %c0_12 = arith.constant 0 : index
    %9 = vector.load %arg2[%c4, %c0_12] : memref<8x128xf32, #tpu.memory_space<vmem>>, vector<1x128xf32>
    %cst_13 = arith.constant dense<0.000000e+00> : vector<8xf32>
    %10 = vector.multi_reduction <add>, %4, %cst_13 [1] : vector<8x128xf32> to vector<8xf32>
    %11 = vector.shape_cast %10 : vector<8xf32> to vector<8x1xf32>
    %cst_14 = arith.constant 3.125000e-02 : f32
    %12 = vector.broadcast %cst_14 : f32 to vector<8x1xf32>
    %13 = arith.mulf %11, %12 : vector<8x1xf32>
    %14 = vector.broadcast %13 : vector<8x1xf32> to vector<8x128xf32>
    %15 = arith.subf %4, %14 : vector<8x128xf32>
    %16 = arith.mulf %15, %15 : vector<8x128xf32>
    %cst_15 = arith.constant dense<0.000000e+00> : vector<8xf32>
    %17 = vector.multi_reduction <add>, %16, %cst_15 [1] : vector<8x128xf32> to vector<8xf32>
    %18 = vector.shape_cast %17 : vector<8xf32> to vector<8x1xf32>
    %cst_16 = arith.constant 9.600000e+01 : f32
    %19 = vector.broadcast %cst_16 : f32 to vector<8x1xf32>
    %20 = arith.mulf %19, %13 : vector<8x1xf32>
    %21 = arith.mulf %20, %13 : vector<8x1xf32>
    %22 = arith.subf %18, %21 : vector<8x1xf32>
    %cst_17 = arith.constant 3.125000e-02 : f32
    %23 = vector.broadcast %cst_17 : f32 to vector<8x1xf32>
    %24 = arith.mulf %22, %23 : vector<8x1xf32>
    %cst_18 = arith.constant 0.000000e+00 : f32
    %25 = vector.broadcast %cst_18 : f32 to vector<8x1xf32>
    %26 = arith.maximumf %24, %25 : vector<8x1xf32>
    %cst_19 = arith.constant 9.99999974E-6 : f32
    %27 = vector.broadcast %cst_19 : f32 to vector<8x1xf32>
    %28 = arith.addf %26, %27 : vector<8x1xf32>
    %29 = math.rsqrt %28 : vector<8x1xf32>
    %30 = vector.broadcast %13 : vector<8x1xf32> to vector<8x128xf32>
    %31 = arith.subf %4, %30 : vector<8x128xf32>
    %32 = vector.broadcast %29 : vector<8x1xf32> to vector<8x128xf32>
    %33 = arith.mulf %31, %32 : vector<8x128xf32>
    %34 = arith.truncf %33 : vector<8x128xf32> to vector<8x128xbf16>
    %c0_20 = arith.constant 0 : index
    %c0_21 = arith.constant 0 : index
    %35 = vector.load %arg3[%c0_20, %c0_21] : memref<128x128xbf16, #tpu.memory_space<vmem>>, vector<128x128xbf16>
    %cst_22 = arith.constant dense<0.000000e+00> : vector<8x128xf32>
    %36 = tpu.matmul %34, %35, %cst_22 {dimension_numbers = #tpu.dot_dimension_numbers<[1], [0], [0], [1], [0, 0, 1, 1], [], []>} : vector<8x128xbf16>, vector<128x128xbf16>, vector<8x128xf32> -> vector<8x128xf32>
    %37 = vector.broadcast %5 : vector<1x128xf32> to vector<8x128xf32>
    %38 = arith.addf %36, %37 : vector<8x128xf32>
    %cst_23 = arith.constant 0.000000e+00 : f32
    %39 = vector.broadcast %cst_23 : f32 to vector<8x128xf32>
    %40 = arith.maximumf %38, %39 : vector<8x128xf32>
    %41 = arith.truncf %40 : vector<8x128xf32> to vector<8x128xbf16>
    %c0_24 = arith.constant 0 : index
    %c0_25 = arith.constant 0 : index
    %42 = vector.load %arg4[%c0_24, %c0_25] : memref<128x128xbf16, #tpu.memory_space<vmem>>, vector<128x128xbf16>
    %cst_26 = arith.constant dense<0.000000e+00> : vector<8x128xf32>
    %43 = tpu.matmul %41, %42, %cst_26 {dimension_numbers = #tpu.dot_dimension_numbers<[1], [0], [0], [1], [0, 0, 1, 1], [], []>} : vector<8x128xbf16>, vector<128x128xbf16>, vector<8x128xf32> -> vector<8x128xf32>
    %44 = vector.broadcast %6 : vector<1x128xf32> to vector<8x128xf32>
    %45 = arith.addf %43, %44 : vector<8x128xf32>
    %cst_27 = arith.constant 0.000000e+00 : f32
    %46 = vector.broadcast %cst_27 : f32 to vector<8x128xf32>
    %47 = arith.maximumf %45, %46 : vector<8x128xf32>
    %48 = arith.truncf %47 : vector<8x128xf32> to vector<8x128xbf16>
    %c0_28 = arith.constant 0 : index
    %c0_29 = arith.constant 0 : index
    %49 = vector.load %arg5[%c0_28, %c0_29] : memref<128x128xbf16, #tpu.memory_space<vmem>>, vector<128x128xbf16>
    %cst_30 = arith.constant dense<0.000000e+00> : vector<8x128xf32>
    %50 = tpu.matmul %48, %49, %cst_30 {dimension_numbers = #tpu.dot_dimension_numbers<[1], [0], [0], [1], [0, 0, 1, 1], [], []>} : vector<8x128xbf16>, vector<128x128xbf16>, vector<8x128xf32> -> vector<8x128xf32>
    %51 = arith.addf %4, %50 : vector<8x128xf32>
    %52 = vector.broadcast %7 : vector<1x128xf32> to vector<8x128xf32>
    %53 = arith.addf %51, %52 : vector<8x128xf32>
    %cst_31 = arith.constant dense<0.000000e+00> : vector<8xf32>
    %54 = vector.multi_reduction <add>, %53, %cst_31 [1] : vector<8x128xf32> to vector<8xf32>
    %55 = vector.shape_cast %54 : vector<8xf32> to vector<8x1xf32>
    %cst_32 = arith.constant 3.125000e-02 : f32
    %56 = vector.broadcast %cst_32 : f32 to vector<8x1xf32>
    %57 = arith.mulf %55, %56 : vector<8x1xf32>
    %58 = vector.broadcast %57 : vector<8x1xf32> to vector<8x128xf32>
    %59 = arith.subf %53, %58 : vector<8x128xf32>
    %60 = arith.mulf %59, %59 : vector<8x128xf32>
    %cst_33 = arith.constant dense<0.000000e+00> : vector<8xf32>
    %61 = vector.multi_reduction <add>, %60, %cst_33 [1] : vector<8x128xf32> to vector<8xf32>
    %62 = vector.shape_cast %61 : vector<8xf32> to vector<8x1xf32>
    %cst_34 = arith.constant 9.600000e+01 : f32
    %63 = vector.broadcast %cst_34 : f32 to vector<8x1xf32>
    %64 = arith.mulf %63, %57 : vector<8x1xf32>
    %65 = arith.mulf %64, %57 : vector<8x1xf32>
    %66 = arith.subf %62, %65 : vector<8x1xf32>
    %cst_35 = arith.constant 3.125000e-02 : f32
    %67 = vector.broadcast %cst_35 : f32 to vector<8x1xf32>
    %68 = arith.mulf %66, %67 : vector<8x1xf32>
    %cst_36 = arith.constant 0.000000e+00 : f32
    %69 = vector.broadcast %cst_36 : f32 to vector<8x1xf32>
    %70 = arith.maximumf %68, %69 : vector<8x1xf32>
    %cst_37 = arith.constant 9.99999974E-6 : f32
    %71 = vector.broadcast %cst_37 : f32 to vector<8x1xf32>
    %72 = arith.addf %70, %71 : vector<8x1xf32>
    %73 = math.rsqrt %72 : vector<8x1xf32>
    %74 = vector.broadcast %57 : vector<8x1xf32> to vector<8x128xf32>
    %75 = arith.subf %53, %74 : vector<8x128xf32>
    %76 = vector.broadcast %73 : vector<8x1xf32> to vector<8x128xf32>
    %77 = arith.mulf %75, %76 : vector<8x128xf32>
    %78 = vector.broadcast %8 : vector<1x128xf32> to vector<8x128xf32>
    %79 = arith.mulf %77, %78 : vector<8x128xf32>
    %80 = vector.broadcast %9 : vector<1x128xf32> to vector<8x128xf32>
    %81 = arith.addf %79, %80 : vector<8x128xf32>
    %82 = vector.extract_strided_slice %81 {offsets = [0, 0], sizes = [8, 32], strides = [1, 1]} : vector<8x128xf32> to vector<8x32xf32>
    %c0_38 = arith.constant 0 : index
    %c0_39 = arith.constant 0 : index
    %83 = vector.load %arg6[%c0_38, %c0_39] : memref<8x32xf32, #tpu.memory_space<vmem>>, vector<8x32xf32>
    tpu.vector_store %arg6[%c0_38, %c0_39], %82 {strides = array<i32>} : memref<8x32xf32, #tpu.memory_space<vmem>>, vector<8x32xf32>,
    return
  }
  func.func @transform_0(%arg0: i32) -> (i32, i32) {
    %c0_i32 = arith.constant 0 : i32
    %c0_i32_0 = arith.constant 0 : i32
    return %arg0, %c0_i32 : i32, i32
  }
  func.func @transform_1(%arg0: i32) -> (i32, i32) {
    %c0_i32 = arith.constant 0 : i32
    %c0_i32_0 = arith.constant 0 : i32
    %c0_i32_1 = arith.constant 0 : i32
    return %c0_i32, %c0_i32_0 : i32, i32
  }
  func.func @transform_2(%arg0: i32) -> (i32, i32) {
    %c0_i32 = arith.constant 0 : i32
    %c0_i32_0 = arith.constant 0 : i32
    %c0_i32_1 = arith.constant 0 : i32
    return %c0_i32, %c0_i32_0 : i32, i32
  }
  func.func @transform_3(%arg0: i32) -> (i32, i32) {
    %c0_i32 = arith.constant 0 : i32
    %c0_i32_0 = arith.constant 0 : i32
    %c0_i32_1 = arith.constant 0 : i32
    return %c0_i32, %c0_i32_0 : i32, i32
  }
  func.func @transform_4(%arg0: i32) -> (i32, i32) {
    %c0_i32 = arith.constant 0 : i32
    %c0_i32_0 = arith.constant 0 : i32
    %c0_i32_1 = arith.constant 0 : i32
    return %c0_i32, %c0_i32_0 : i32, i32
  }
  func.func @transform_5(%arg0: i32) -> (i32, i32) {
    %c0_i32 = arith.constant 0 : i32
    %c0_i32_0 = arith.constant 0 : i32
    return %arg0, %c0_i32 : i32, i32
  }
}

</mosaic_0001>

<bundles_post_ra>
// kernel: tpu_custom_call.1
= control target key start
LH: loop header
LB: loop body
LE: loop exit
PB: predicated region body
PF: predicated region fallthrough
CT: control target
= control target key end

     0   :  { %10 = vsyncpa [#allocation4], 0  ;;  %s1638_s0 = inlined_call_operand.hbm [shape: f32[16,32], index: 0, kind: input, shape index: {}]   ;;  %s1639_s1 = inlined_call_operand.hbm [shape: f32[8,128], index: 1, kind: input, shape index: {}]   ;;  %s1640_s2 = inlined_call_operand.hbm [shape: bf16[128,128], index: 2, kind: input, shape index: {}]   ;;  %s1641_s3 = inlined_call_operand.hbm [shape: bf16[128,128], index: 3, kind: input, shape index: {}]   ;;  %s1642_s4 = inlined_call_operand.hbm [shape: bf16[128,128], index: 4, kind: input, shape index: {}]   ;;  %s1643_s5 = inlined_call_operand.hbm [shape: f32[16,32], index: 5, kind: output, shape index: {}]  }
   0x1   :  { %12 = vsyncpa [#allocation4 + $0x1], 0 }
   0x2   :  { %13 = vsyncpa [#allocation7], 0 }
   0x3   :  { %14 = vsyncpa [#allocation10], 0 }
   0x4   :  { %15 = vsyncpa [#allocation5], 0 }
   0x5   :  { %17 = vsyncpa [#allocation5 + $0x1], 0  ;;  %s1314_s18 = smov 0   ;;  %s1316_s19 = smov 0  }
   0x6   :  { %s1318_s20 = smov 0   ;;  %s1320_s21 = smov 0  }
   0x7 LB: > { %s1274_s22 = smov [#allocation6]   ;;  %s1335_s24 = sadd.s32 4294967295, %s1272_s21   ;;  %s1272_s21 = sphi %s1320_s21, %s1667_s21   ;;  %s1268_s20 = sphi %s1318_s20, %s1666_s20   ;;  %s1264_s19 = sphi %s1316_s19, %s1665_s19   ;;  %s1260_s18 = sphi %s1314_s18, %s1664_s18  }
   0x8   : > { %s177_s23 = sshll.u32 %s1274_s22, 4  ;;  %p802_p0 = scmp.ge.s32.totalorder %s1272_s21, 1  ;;  %s178_s23 = int_to_ptr.vmem [resolvable:$true] %s177_s23 }
   0x9   : > { %p1644_p1 = scmp.eq.s32.totalorder %s1335_s24, 0  ;;  %p164_p2 = scmp.lt.s32.totalorder %s1272_s21, 3 }
   0xa   : > { %s1275_s26 = smov [#allocation9]   ;;  %s1276_s29 = smov [#allocation8]  }
   0xb   : > { %p1340_p3 = pnand %p802_p0, %p164_p2  ;;  %s200_s27 = sshll.u32 %s1275_s26, 4  ;;  %s1353_s27 = int_to_ptr.vmem [resolvable:$true] %s200_s27 }
   0xc   : > { %s187_s30 = sshll.u32 %s1276_s29, 4  ;;  %s1056_s8 = scalar_lea.hbm %s1639_s1, 128  ;;  %s1355_s30 = int_to_ptr.vmem [resolvable:$true] %s187_s30 }
   0xd   : > { %s1647_s25 = scalar_select %p1340_p3, 1, 0 }
   0xe   : > { %p957_p5 = pneg %p1340_p3  ;;  %p1057_p7 = scmp.ne.s32.totalorder %s1639_s1, %s1056_s8 }
   0xf   : > { %p1063_p11 = scmp.lt.u32.totalorder %s1056_s8, %s1639_s1 }
  0x10   : > { %p1349_p6 = pnand %p957_p5, %p1644_p1 }
  0x12   : > { %p1365_p8 = pneg %p1349_p6 }
  0x14   : > { %p1059_p9 = pnand %p1365_p8, %p1057_p7 }
  0x16   : > { %p1060_p10 = pneg %p1059_p9 }
  0x18   : > { %p1065_p12 = pnand %p1063_p11, %p1060_p10 }
  0x1a   : > { %1068 = shalt.err (!%p1065_p12)
}
  0x1b   : > { %s1069_s14 = scalar_lea.vmem %s178_s23, 128  ;;  %p1077_p5 = scmp.lt.s32.totalorder %s178_s23, %s178_s23 }
  0x1c   : > { %p1070_p13 = scmp.ne.s32.totalorder %s178_s23, %s1069_s14  ;;  %p1078_p4 = scmp.lt.s32.totalorder %s1069_s14, %s1069_s14 }
  0x1e   : > { %p1072_p0 = pnand %p1070_p13, %p1365_p8  ;;  %p1079_p1 = por %p1078_p4, %p1077_p5 }
  0x20   : > { %p1073_p2 = pneg %p1072_p0 }
  0x22   : > { %p1080_p3 = pnand %p1079_p1, %p1073_p2 }
  0x24   : > { %1083 = shalt.err (!%p1080_p3)
}
  0x25   : > { %960 = dma.hbm_to_vmem [thread:$0]  (!%p1349_p6), %s1639_s1, 128, %s178_s23, [#allocation7]  }
  0x26   : > { %s1084_s26 = scalar_lea.hbm %s1641_s3, 1024 }
  0x27   : > { %p1085_p7 = scmp.ne.s32.totalorder %s1641_s3, %s1084_s26  ;;  %p1091_p1 = scmp.lt.u32.totalorder %s1084_s26, %s1641_s3 }
  0x29   : > { %p1087_p9 = pnand %p1085_p7, %p1365_p8 }
  0x2b   : > { %p1088_p4 = pneg %p1087_p9 }
  0x2d   : > { %p1093_p3 = pnand %p1091_p1, %p1088_p4 }
  0x2f   : > { %1096 = shalt.err (!%p1093_p3)
}
  0x30   : > { %s1097_s23 = scalar_lea.vmem %s1353_s27, 1024  ;;  %p1105_p13 = scmp.lt.s32.totalorder %s1353_s27, %s1353_s27 }
  0x31   : > { %p1098_p10 = scmp.ne.s32.totalorder %s1353_s27, %s1097_s23  ;;  %p1106_p0 = scmp.lt.s32.totalorder %s1097_s23, %s1097_s23 }
  0x33   : > { %p1100_p11 = pnand %p1098_p10, %p1365_p8  ;;  %p1107_p2 = por %p1106_p0, %p1105_p13 }
  0x35   : > { %p1101_p12 = pneg %p1100_p11 }
  0x37   : > { %p1108_p5 = pnand %p1107_p2, %p1101_p12 }
  0x39   : > { %1111 = shalt.err (!%p1108_p5)
}
  0x3a   : > { %s1277_s9 = smov 64   ;;  %s1278_s10 = smov 4  }
  0x3b   : > { %966 = dma.hbm_to_vmem [thread:$0]  (!%p1349_p6), %s1641_s3, 1024, %s1353_s27, [#allocation10], %s1277_s9, %s1277_s9, %s1278_s10  }
  0x3c   : > { %s1112_s16 = scalar_lea.hbm %s1640_s2, 1024 }
  0x3d   : > { %p1113_p7 = scmp.ne.s32.totalorder %s1640_s2, %s1112_s16  ;;  %p1119_p1 = scmp.lt.u32.totalorder %s1112_s16, %s1640_s2 }
  0x3f   : > { %p1115_p9 = pnand %p1113_p7, %p1365_p8 }
  0x41   : > { %p1116_p4 = pneg %p1115_p9 }
  0x43   : > { %p1121_p3 = pnand %p1119_p1, %p1116_p4 }
  0x45   : > { %1124 = shalt.err (!%p1121_p3)
}
  0x46   : > { %s1125_s27 = scalar_lea.vmem %s1355_s30, 1024  ;;  %p1133_p13 = scmp.lt.s32.totalorder %s1355_s30, %s1355_s30 }
  0x47   : > { %p1126_p10 = scmp.ne.s32.totalorder %s1355_s30, %s1125_s27  ;;  %p1134_p0 = scmp.lt.s32.totalorder %s1125_s27, %s1125_s27 }
  0x49   : > { %p1128_p11 = pnand %p1126_p10, %p1365_p8  ;;  %p1135_p2 = por %p1134_p0, %p1133_p13 }
  0x4b   : > { %p1129_p12 = pneg %p1128_p11 }
  0x4d   : > { %p1136_p5 = pnand %p1135_p2, %p1129_p12 }
  0x4f   : > { %1139 = shalt.err (!%p1136_p5)
}
  0x50   : > { %963 = dma.hbm_to_vmem [thread:$0]  (!%p1349_p6), %s1640_s2, 1024, %s1355_s30, [#allocation7], %s1277_s9, %s1277_s9, %s1278_s10  }
  0x51   : > { %s1279_s8 = smov [#allocation11]   ;;  %s1140_s14 = scalar_lea.hbm %s1642_s4, 1024 }
  0x52   : > { %s213_s23 = sshll.u32 %s1279_s8, 4  ;;  %p1141_p7 = scmp.ne.s32.totalorder %s1642_s4, %s1140_s14  ;;  %s214_s23 = int_to_ptr.vmem [resolvable:$true] %s213_s23 }
  0x53   : > { %p1147_p1 = scmp.lt.u32.totalorder %s1140_s14, %s1642_s4 }
  0x54   : > { %p1143_p9 = pnand %p1141_p7, %p1365_p8 }
  0x56   : > { %p1144_p4 = pneg %p1143_p9 }
  0x58   : > { %p1149_p3 = pnand %p1147_p1, %p1144_p4 }
  0x5a   : > { %1152 = shalt.err (!%p1149_p3)
}
  0x5b   : > { %s1153_s30 = scalar_lea.vmem %s214_s23, 1024  ;;  %p1161_p13 = scmp.lt.s32.totalorder %s214_s23, %s214_s23 }
  0x5c   : > { %p1154_p10 = scmp.ne.s32.totalorder %s214_s23, %s1153_s30  ;;  %p1162_p0 = scmp.lt.s32.totalorder %s1153_s30, %s1153_s30 }
  0x5e   : > { %p1156_p11 = pnand %p1154_p10, %p1365_p8  ;;  %p1163_p2 = por %p1162_p0, %p1161_p13 }
  0x60   : > { %p1157_p12 = pneg %p1156_p11 }
  0x62   : > { %p1164_p5 = pnand %p1163_p2, %p1157_p12 }
  0x64   : > { %1167 = shalt.err (!%p1164_p5)
}
  0x65   : > { %969 = dma.hbm_to_vmem [thread:$0]  (!%p1349_p6), %s1642_s4, 1024, %s214_s23, [#allocation10], %s1277_s9, %s1277_s9, %s1278_s10  }
  0x66   : > { %s801_s28 = sadd.s32 4294967294, %s1272_s21   ;;  %s1456_s11 = sadd.s32 1, %s1272_s21  }
  0x67   : > { %s27_s27 = ssub.s32 %s1272_s21, %s1456_s11  ;;  %s30_s6 = sadd.s32 1, %s1268_s20 }
  0x68   : > { %p28_p8 = scmp.eq.s32.totalorder %s27_s27, 0  ;;  %p37_p7 = scmp.ne.s32.totalorder %s1268_s20, %s1264_s19 }
  0x69   : > { %p38_p9 = scmp.eq.s32.totalorder %s1272_s21, 0  ;;  %p43_p4 = scmp.ne.s32.totalorder %s1264_s19, %s1260_s18 }
  0x6a   : > { %s1467_s7 = scalar_select %p28_p8, %s1268_s20, %s30_s6  }
  0x6b   : > { %p1469_p1 = por %p38_p9, %p37_p7  ;;  %p1651_p3 = scmp.eq.s32.totalorder %s1335_s24, 0 }
  0x6c   : > { %p151_p10 = scmp.eq.s32.totalorder %s1335_s24, 1  ;;  %p157_p11 = scmp.eq.s32.totalorder %s801_s28, 1 }
  0x6d   : > { %p1475_p6 = por %p1651_p3, %p43_p4  ;;  %p982_p12 = scmp.lt.s32.totalorder %s1272_s21, 2 }
  0x6e   : > { %s227_s10 = sand.u32 1, %s1268_s20   ;;  %p1482_p13 = por %p151_p10, %p37_p7 }
  0x6f   : > { %p1486_p0 = por %p157_p11, %p43_p4  ;;  %s808_s13 = sshll.u32 %s227_s10, 3 }
  0x70   : > { %s1653_s23 = scalar_select %p1482_p13, 1, 0 }
  0x71   : > { %s1654_s12 = scalar_select %p1486_p0, 1, 0 }
  0x72   : > { %s809_s14 = sshll.u32 %s1272_s21, 7  ;;  %s231_s22 = scalar_lea.vmem [#allocation3], %s808_s13 }
  0x73   : > { %s1494_s17 = scalar_lea.hbm %s1638_s0, %s809_s14  ;;  %s238_s30 = sshll.u32 %s231_s22, 4  ;;  %s1496_s30 = int_to_ptr.vmem [resolvable:$true] %s238_s30 }
  0x74   : > { %p1500_p2 = pnand %p982_p12, %p1469_p1  ;;  %s228_s29 = scalar_lea.sflag [#allocation4], %s227_s10 }
  0x75   : > { %s1168_s28 = scalar_lea.hbm %s1494_s17, 128  ;;  %s1173_s13 = scalar_lea.hbm %s1638_s0, 256 }
  0x76   : > { %p1169_p5 = scmp.ne.s32.totalorder %s1494_s17, %s1168_s28  ;;  %p1170_p8 = pneg %p1500_p2 }
  0x77   : > { %p1174_p4 = scmp.lt.u32.totalorder %s1494_s17, %s1638_s0  ;;  %p1175_p1 = scmp.lt.u32.totalorder %s1173_s13, %s1168_s28 }
  0x78   : > { %p1171_p7 = pnand %p1170_p8, %p1169_p5  ;;  %p1177_p10 = scmp.lt.u32.totalorder %s1168_s28, %s1494_s17 }
  0x79   : > { %p1176_p3 = por %p1175_p1, %p1174_p4 }
  0x7a   : > { %p1172_p9 = pneg %p1171_p7 }
  0x7b   : > { %p1178_p11 = por %p1177_p10, %p1176_p3 }
  0x7d   : > { %p1179_p12 = pnand %p1178_p11, %p1172_p9 }
  0x7f   : > { %1182 = shalt.err (!%p1179_p12)
}
  0x80   : > { %s1183_s10 = scalar_lea.vmem %s1496_s30, 128  ;;  %s1280_s15 = smov [#allocation3]  }
  0x81   : > { %p1184_p5 = scmp.ne.s32.totalorder %s1496_s30, %s1183_s10  ;;  %s1188_s16 = sshll.u32 %s1280_s15, 4  ;;  %s1189_s16 = int_to_ptr.vmem [resolvable:$false] %s1188_s16 }
  0x82   : > { %s1190_s22 = scalar_lea.vmem %s1189_s16, 256  ;;  %p1191_p13 = scmp.lt.s32.totalorder %s1496_s30, %s1189_s16 }
  0x83   : > { %p1186_p7 = pnand %p1184_p5, %p1170_p8  ;;  %p1192_p4 = scmp.lt.s32.totalorder %s1190_s22, %s1183_s10 }
  0x85   : > { %p1187_p0 = pneg %p1186_p7  ;;  %p1193_p1 = por %p1192_p4, %p1191_p13 }
  0x87   : > { %p1194_p3 = pnand %p1193_p1, %p1187_p0 }
  0x89   : > { %1197 = shalt.err (!%p1194_p3)
}
  0x8a   : > { %973 = dma.hbm_to_vmem [thread:$0]  (!%p1500_p2), %s1494_s17, 128, %s1496_s30, %s228_s29  }
  0x8b   : > { %p1656_p9 = scmp.ne.s32.totalorder %s1647_s25, 0 }
  0x8c   : > { %s1532_s28 = sand.u32 (!%p1656_p9), 1, %s1264_s19  }
  0x8d   : > { %247 = sbr.rel (%p1656_p9) target bundleno = 1460 (0x5b4), region = 40  ;;  %s811_s27 = sshll.u32 (!%p1656_p9), %s1532_s28, 3 }
  0x8e   : > { %s250_s6 = scalar_lea.sflag (!%p1656_p9), [#allocation4], %s1532_s28  ;;  %s253_s13 = scalar_lea.vmem (!%p1656_p9), [#allocation3], %s811_s27 }
  0x94   : > { %1243 = dma.done.wait (%p1475_p6), %s250_s6, 128  }
  0x95   : > { %1245 = vsyncadd (%p1475_p6), %s250_s6, 4294967168  ;;  %p1657_p13 = scmp.eq.s32.totalorder %s1335_s24, 0 }
  0x97   : > { %1247 = dma.done.wait (%p1657_p13), [#allocation7], 1152   ;;  %p1658_p0 = pmov %p1657_p13 }
  0x99   : > { %1249 = vsyncadd (%p1658_p0), [#allocation7], 4294966144  ;;  %p1659_p2 = pmov %p1658_p0 }
  0x9a   : > { %p1660_p8 = pmov %p1658_p0 }
  0x9b   : > { %1251 = dma.done.wait (%p1659_p2), [#allocation10], 2048  }
  0x9c   : > { %1253 = vsyncadd (%p1660_p8), [#allocation10], 4294965248  ;;  %v1281_v0 = vmov 0.0   ;;  %vm299_vm0 = vcmask 261120   ;;  %v298_v1 = vld [vmem:[%s253_s13] sm:$0xff]  ;;  %v1028_v3 = vld [vmem:[#allocation8] sm:$0xff]  }
  0x9d   : > { %297 = vst [vmem:[#allocation2] sm:$0xff] %v1281_v0  ;;  %877 = vmatprep.subr.bf16.mxu0 %v1281_v0  ;;  %897 = vmatprep.subr.bf16.mxu1 %v1281_v0  ;;  %v1029_v4 = vld [vmem:[#allocation8 + $0x8] sm:$0xff]   ;;  %v1030_v9 = vld [vmem:[#allocation8 + $0x10] sm:$0xff]   ;;  %v1031_v10 = vld [vmem:[#allocation8 + $0x18] sm:$0xff]   ;;  %vm1282_vm1 = vmmov 0   ;;  %s847_s25 = sshll.u32 %s1335_s24, 7 }
  0x9e   : > { %300 = vst.msk [vmem:[#allocation2] sm:$0xff] %vm299_vm0, %v298_v1  ;;  %878 = vmatpush3.bf16.msra.mxu0 %v1028_v3  ;;  %v1032_v11 = vld [vmem:[#allocation8 + $0x20] sm:$0xff]   ;;  %v1033_v12 = vld [vmem:[#allocation8 + $0x28] sm:$0xff]   ;;  %893 = vmatprep.mubr.msk.bf16.mxu0 %vm1282_vm1, %v1281_v0  ;;  %v1034_v13 = vld [vmem:[#allocation8 + $0x30] sm:$0xff]   ;;  %s295_s9 = scalar_lea.vmem [#allocation12], %s811_s27  ;;  %s1593_s29 = scalar_lea.hbm %s1643_s5, %s847_s25 }
  0x9f   : > { %879 = vmatprep.subr.bf16.mxu0 %v1281_v0  ;;  %913 = vmatprep.mubr.msk.bf16.mxu1 %vm1282_vm1, %v1281_v0  ;;  %v1035_v14 = vld [vmem:[#allocation8 + $0x38] sm:$0xff]   ;;  %v1036_v15 = vld [vmem:[#allocation9] sm:$0xff]   ;;  %v1037_v16 = vld [vmem:[#allocation9 + $0x8] sm:$0xff]   ;;  %s693_s17 = sshll.u32 %s295_s9, 4  ;;  %s680_s8 = scalar_lea.sflag [#allocation5], %s1532_s28  ;;  %s1595_s17 = int_to_ptr.vmem [resolvable:$true] %s693_s17 }
  0xa0   : > { %898 = vmatpush3.bf16.msra.mxu1 %v1036_v15  ;;  %v1038_v17 = vld [vmem:[#allocation9 + $0x10] sm:$0xff]   ;;  %v1039_v18 = vld [vmem:[#allocation9 + $0x18] sm:$0xff]   ;;  %v1040_v19 = vld [vmem:[#allocation9 + $0x20] sm:$0xff]   ;;  %s1198_s14 = scalar_lea.vmem %s1595_s17, 128  ;;  %p1661_p10 = scmp.ne.s32.totalorder %s1653_s23, 0 }
  0xa1   : > { %899 = vmatprep.subr.bf16.mxu1 %v1281_v0  ;;  %v1041_v20 = vld [vmem:[#allocation9 + $0x28] sm:$0xff]   ;;  %v1042_v31 = vld [vmem:[#allocation9 + $0x30] sm:$0xff]   ;;  %v1043_v32 = vld [vmem:[#allocation9 + $0x38] sm:$0xff]   ;;  %p1199_p6 = scmp.ne.s32.totalorder %s1595_s17, %s1198_s14  ;;  %s1283_s24 = smov [#allocation12]  }
  0xa2   : > { %880 = vmatpush3.bf16.msra.mxu0 %v1029_v4  ;;  %v1044_v33 = vld [vmem:[#allocation11] sm:$0xff]   ;;  %v1045_v34 = vld [vmem:[#allocation11 + $0x8] sm:$0xff]   ;;  %v1046_v35 = vld [vmem:[#allocation11 + $0x10] sm:$0xff]   ;;  %s1202_s10 = sshll.u32 %s1283_s24, 4  ;;  %s1203_s10 = int_to_ptr.vmem [resolvable:$false] %s1202_s10 }
  0xa3   : > { %881 = vmatprep.subr.bf16.mxu0 %v1281_v0  ;;  %v1047_v36 = vld [vmem:[#allocation11 + $0x18] sm:$0xff]   ;;  %v1048_v37 = vld [vmem:[#allocation11 + $0x20] sm:$0xff]   ;;  %v1049_v38 = vld [vmem:[#allocation11 + $0x28] sm:$0xff]   ;;  %p1200_p11 = pnand %p1199_p6, %p1661_p10  ;;  %s1204_s15 = scalar_lea.vmem %s1203_s10, 256 }
  0xa4   : > { %900 = vmatpush3.bf16.msra.mxu1 %v1037_v16  ;;  %v817_v39 = vld [vmem:[#allocation6] ss:$0 sm:$0xff]  ;;  %v1050_v47 = vld [vmem:[#allocation11 + $0x30] sm:$0xff]   ;;  %v826_v49 = vld [vmem:[#allocation6 + $0x1] ss:$0 sm:$0xff]  ;;  %p1205_p5 = scmp.lt.s32.totalorder %s1595_s17, %s1203_s10  ;;  %p1206_p7 = scmp.lt.s32.totalorder %s1204_s15, %s1198_s14 }
  0xa5   : > { %v1554_v2 = vld [vmem:[#allocation2] sm:$0xff]  ;;  %901 = vmatprep.subr.bf16.mxu1 %v1281_v0  ;;  %v1051_v48 = vld [vmem:[#allocation11 + $0x38] sm:$0xff]   ;;  %p1201_p12 = pneg %p1200_p11 }
  0xa6   : > { %307 = vadd.xlane.f32.xlu0 %v1554_v2  ;;  %882 = vmatpush3.bf16.msra.mxu0 %v1030_v9  ;;  %v843_v58 = vld [vmem:[#allocation6 + $0x2] ss:$0 sm:$0xff]  ;;  %p1207_p4 = por %p1206_p7, %p1205_p5 }
  0xa7   : > { %883 = vmatprep.subr.bf16.mxu0 %v1281_v0 }
  0xa8   : > { %902 = vmatpush3.bf16.msra.mxu1 %v1038_v17  ;;  %p1208_p1 = pnand %p1207_p4, %p1201_p12 }
  0xa9   : > { %903 = vmatprep.subr.bf16.mxu1 %v1281_v0 }
  0xaa   : > { %884 = vmatpush3.bf16.msra.mxu0 %v1031_v10 }
  0xab   : > { %885 = vmatprep.subr.bf16.mxu0 %v1281_v0 }
  0xac   : > { %904 = vmatpush3.bf16.msra.mxu1 %v1039_v18 }
  0xad   : > { %905 = vmatprep.subr.bf16.mxu1 %v1281_v0 }
  0xae   : > { %886 = vmatpush3.bf16.msra.mxu0 %v1032_v11 }
  0xaf   : > { %887 = vmatprep.subr.bf16.mxu0 %v1281_v0 }
  0xb0   : > { %906 = vmatpush3.bf16.msra.mxu1 %v1040_v19 }
  0xb1   : > { %907 = vmatprep.subr.bf16.mxu1 %v1281_v0 }
  0xb2   : > { %888 = vmatpush3.bf16.msra.mxu0 %v1033_v12  ;;  %v844_v12 = vld [vmem:[#allocation6 + $0x3] ss:$0 sm:$0xff] }
  0xb3   : > { %889 = vmatprep.subr.bf16.mxu0 %v1281_v0 }
  0xb4   : > { %908 = vmatpush3.bf16.msra.mxu1 %v1041_v20 }
  0xb5   : > { %909 = vmatprep.subr.bf16.mxu1 %v1281_v0 }
  0xb6   : > { %890 = vmatpush3.bf16.msra.mxu0 %v1034_v13 }
  0xb7   : > { %891 = vmatprep.subr.bf16.mxu0 %v1281_v0 }
  0xb8   : > { %910 = vmatpush3.bf16.msra.mxu1 %v1042_v31 }
  0xb9   : > { %911 = vmatprep.subr.bf16.mxu1 %v1281_v0 }
  0xba   : > { %892 = vmatpush3.bf16.msra.mxu0 %v1035_v14  ;;  %v845_v14 = vld [vmem:[#allocation6 + $0x4] ss:$0 sm:$0xff] }
  0xbb   : > { %917 = vmatprep.subr.bf16.mxu0 %v1281_v0 }
  0xbc   : > { %912 = vmatpush3.bf16.msra.mxu1 %v1043_v32 }
 0x133   : > { %v308_v5 = vpop.xlane.xlu0 %307 }
 0x134   : > { %v309_v6 = vmul.f32 0.03125, %v308_v5 }
 0x136   : > { %v310_v7 = vsub.f32 %v1554_v2, %v309_v6  ;;  %v314_v21 = vmul.f32 96.0, %v309_v6 }
 0x138   : > { %v311_v8 = vmul.f32 %v310_v7, %v310_v7  ;;  %v315_v22 = vmul.f32 %v314_v21, %v309_v6 }
 0x13a   : > { %312 = vadd.xlane.f32.xlu0 %v311_v8 }
 0x1c7   : > { %v313_v23 = vpop.xlane.xlu0 %312 }
 0x1c8   : > { %v316_v24 = vsub.f32 %v313_v23, %v315_v22 }
 0x1ca   : > { %v317_v25 = vmul.f32 0.03125, %v316_v24 }
 0x1cc   : > { %v318_v26 = vmax.f32 %v317_v25, 0.0 }
 0x1ce   : > { %v319_v27 = vadd.f32 1e-05, %v318_v26 }
 0x1d0   : > { %1052 = vrsqrt.f32 %v319_v27 }
 0x1da   : > { %v1053_v28 = vpop.eup %1052 }
 0x1db   : > { %v321_v29 = vmul.f32 %v1053_v28, %v310_v7 }
 0x1dd   : > { %v322_v30 = vpack.c.bf16 %v321_v29, %v321_v29 }
 0x1df   : > { %894 = vmatmul.mubr.bf16.vlgmr.msra.gmra.mrb[0].mxu0 %v322_v30 }
 0x1e0   : > { %933 = vmatprep.mubr.msk.bf16.mxu0 %vm1282_vm1, %v1281_v0  ;;  %918 = vmatpush3.bf16.msra.mxu0 %v1044_v33 }
 0x1e1   : > { %919 = vmatprep.subr.bf16.mxu0 %v1281_v0 }
 0x1e4   : > { %920 = vmatpush3.bf16.msra.mxu0 %v1045_v34 }
 0x1e5   : > { %921 = vmatprep.subr.bf16.mxu0 %v1281_v0 }
 0x1e8   : > { %922 = vmatpush3.bf16.msra.mxu0 %v1046_v35 }
 0x1e9   : > { %923 = vmatprep.subr.bf16.mxu0 %v1281_v0 }
 0x1ec   : > { %924 = vmatpush3.bf16.msra.mxu0 %v1047_v36 }
 0x1ed   : > { %925 = vmatprep.subr.bf16.mxu0 %v1281_v0 }
 0x1f0   : > { %926 = vmatpush3.bf16.msra.mxu0 %v1048_v37 }
 0x1f1   : > { %927 = vmatprep.subr.bf16.mxu0 %v1281_v0 }
 0x1f4   : > { %928 = vmatpush3.bf16.msra.mxu0 %v1049_v38 }
 0x1f5   : > { %929 = vmatprep.subr.bf16.mxu0 %v1281_v0 }
 0x1f8   : > { %930 = vmatpush3.bf16.msra.mxu0 %v1050_v47 }
 0x1f9   : > { %931 = vmatprep.subr.bf16.mxu0 %v1281_v0 }
 0x1fc   : > { %932 = vmatpush3.bf16.msra.mxu0 %v1051_v48 }
 0x2b2   : > { %v425_v40 = vpop.f32.mrb[0].mxu0 }
 0x2b3   : > { %v426_v41 = vadd.f32 %v817_v39, %v425_v40  ;;  %v895_v42 = vpop.f32.mrb[1].mxu0 }
 0x2b4   : > { %v428_v43 = vpop.f32.mrb[2].mxu0 }
 0x2b5   : > { %v431_v44 = vmax.f32 %v426_v41, 0.0  ;;  %v896_v45 = vpop.f32.mrb[3].mxu0 }
 0x2b7   : > { %v432_v46 = vpack.c.bf16 %v431_v44, %v431_v44 }
 0x2b9   : > { %914 = vmatmul.mubr.bf16.vlgmr.msra.gmra.mrb[0].mxu1 %v432_v46 }
 0x38c   : > { %v535_v50 = vpop.f32.mrb[0].mxu1 }
 0x38d   : > { %v536_v51 = vadd.f32 %v826_v49, %v535_v50  ;;  %v915_v52 = vpop.f32.mrb[1].mxu1 }
 0x38e   : > { %v538_v53 = vpop.f32.mrb[2].mxu1 }
 0x38f   : > { %v541_v54 = vmax.f32 %v536_v51, 0.0  ;;  %v916_v55 = vpop.f32.mrb[3].mxu1 }
 0x391   : > { %v542_v56 = vpack.c.bf16 %v541_v54, %v541_v54 }
 0x393   : > { %934 = vmatmul.mubr.bf16.vlgmr.msra.gmra.mrb[4].mxu0 %v542_v56 }
 0x466   : > { %v641_v57 = vpop.f32.mrb[4].mxu0 }
 0x467   : > { %v647_v59 = vadd.f32 %v641_v57, %v1554_v2  ;;  %v935_v60 = vpop.f32.mrb[5].mxu0 }
 0x468   : > { %v644_v61 = vpop.f32.mrb[6].mxu0 }
 0x469   : > { %v936_v62 = vpop.f32.mrb[7].mxu0  ;;  %v652_v63 = vadd.f32 %v843_v58, %v647_v59 }
 0x46b   : > { %653 = vadd.xlane.f32.xlu1 %v652_v63 }
 0x4f8   : > { %v654_v0 = vpop.xlane.xlu1 %653 }
 0x4f9   : > { %v655_v1 = vmul.f32 0.03125, %v654_v0 }
 0x4fb   : > { %v656_v3 = vsub.f32 %v652_v63, %v655_v1  ;;  %v660_v5 = vmul.f32 96.0, %v655_v1 }
 0x4fd   : > { %v657_v4 = vmul.f32 %v656_v3, %v656_v3  ;;  %v661_v6 = vmul.f32 %v660_v5, %v655_v1 }
 0x4ff   : > { %658 = vadd.xlane.f32.xlu1 %v657_v4 }
 0x58c   : > { %v659_v7 = vpop.xlane.xlu1 %658 }
 0x58d   : > { %v662_v8 = vsub.f32 %v659_v7, %v661_v6 }
 0x58f   : > { %v663_v9 = vmul.f32 0.03125, %v662_v8 }
 0x591   : > { %v664_v10 = vmax.f32 %v663_v9, 0.0 }
 0x593   : > { %v665_v2 = vadd.f32 1e-05, %v664_v10 }
 0x595   : > { %1054 = vrsqrt.f32 %v665_v2 }
 0x59f   : > { %v1055_v11 = vpop.eup %1054 }
 0x5a0   : > { %v667_v13 = vmul.f32 %v1055_v11, %v656_v3 }
 0x5a2   : > { %v672_v15 = vmul.f32 %v844_v12, %v667_v13 }
 0x5a4   : > { %v677_v16 = vadd.f32 %v845_v14, %v672_v15 }
 0x5a6   : > { %678 = vst.msk [vmem:[%s295_s9] sm:$0xff] %vm299_vm0, %v677_v16 }
 0x5a7   : > { %1211 = shalt.err (!%p1208_p1)
}
 0x5a8   : > { %s1212_s16 = scalar_lea.hbm %s1593_s29, 128  ;;  %s1216_s27 = scalar_lea.hbm %s1643_s5, 256 }
 0x5a9   : > { %p1213_p3 = scmp.ne.s32.totalorder %s1593_s29, %s1212_s16  ;;  %p1217_p0 = scmp.lt.u32.totalorder %s1593_s29, %s1643_s5 }
 0x5aa   : > { %p1218_p2 = scmp.lt.u32.totalorder %s1216_s27, %s1212_s16  ;;  %p1220_p6 = scmp.lt.u32.totalorder %s1212_s16, %s1593_s29 }
 0x5ab   : > { %p1214_p9 = pnand %p1213_p3, %p1661_p10 }
 0x5ac   : > { %p1219_p8 = por %p1218_p2, %p1217_p0 }
 0x5ad   : > { %p1215_p13 = pneg %p1214_p9 }
 0x5ae   : > { %p1221_p11 = por %p1220_p6, %p1219_p8 }
 0x5b0   : > { %p1222_p12 = pnand %p1221_p11, %p1215_p13 }
 0x5b2   : > { %1225 = shalt.err (!%p1222_p12)
}
 0x5b3   : > { %955 = dma.vmem_to_hbm [thread:$0]  (%p1661_p10), %s1595_s17, 128, %s1593_s29, %s680_s8  }
 0x5b4 PF: > { %s705_s25 = sand.u32 1, %s1260_s18   ;;  %p1662_p5 = scmp.ne.s32.totalorder %s1654_s12, 0 }
 0x5b5   : > { %p1663_p7 = scmp.ge.s32.totalorder %s1272_s21, 2  ;;  %s706_s9 = scalar_lea.sflag [#allocation5], %s705_s25 }
 0x5b7   : > { %p975_p4 = pnand %p1663_p7, %p1662_p5 }
 0x5b9   : > { %1255 = dma.done.wait (!%p975_p4), %s706_s9, 128  }
 0x5ba   : > { %1257 = vsyncadd (!%p975_p4), %s706_s9, 4294967168  ;;  %p20_p1 = scmp.ge.s32.totalorder %s1456_s11, 4   ;;  %s1664_s18 = smov %s1264_s19 }
 0x5bb   : > { %s1665_s19 = smov %s1268_s20  ;;  %s1666_s20 = smov %s1467_s7 }
 0x5bc   : > { %s1667_s21 = smov %s1456_s11  ;;  %22 = sbr.rel (!%p20_p1) target bundleno = 7 (0x7), region = 101 }
 0x5c3   :  { %711 = vsyncpa [#allocation4], 1 }
 0x5c4   :  { %713 = vsyncpa [#allocation4 + $0x1], 1 }
 0x5c5   :  { %714 = vsyncpa [#allocation7], 1 }
 0x5c6   :  { %715 = vsyncpa [#allocation10], 1 }
 0x5c7   :  { %716 = vsyncpa [#allocation5], 1 }
 0x5c8   :  { %718 = vsyncpa [#allocation5 + $0x1], 1 }

</bundles_post_ra>
